<compile_context>
chip_gen: v7x
topology: tpu7x:2x2x1
jax: 0.10.0
libtpu: 0.0.40
codegen_flags: <defaults>
</compile_context>

<pallas_src>
import functools

import numpy as np
import jax
import jax.numpy as jnp
from jax.experimental import pallas as pl
from jax.experimental.pallas import tpu as pltpu


def _generate_opt_means(C, p, L):
    """Same construction as the PyTorch reference (numpy, float64)."""
    opt_means = np.zeros((L, p))
    opt_means[0][0] = 1
    for i in range(1, L):
        for j in range(i):
            opt_means[i][j] = -(1 / (L - 1) + np.dot(opt_means[i], opt_means[j])) / opt_means[j][j]
        opt_means[i][i] = np.sqrt(np.abs(1 - np.linalg.norm(opt_means[i]) ** 2))
    opt_means = C * opt_means
    return opt_means


def _round_up(n, m):
    return ((n + m - 1) // m) * m


def _pick_tb(b, p, itemsize):
    """Batch tile: exact divisor of b (no HBM pad copy), prefer >=2 grid steps
    (v7x second TensorCore), as large as possible, with the double-buffered
    x tile kept under ~16 MiB of VMEM."""
    budget = 16 * 1024 * 1024
    cands = [c for c in (512, 384, 256, 128, 64, 32, 16, 8)
             if 2 * c * _round_up(p, 128) * itemsize <= budget]
    if not cands:
        cands = [8]
    for c in cands:                      # prefer >=2 grid steps
        if b % c == 0 and b // c >= 2:
            return c
    for c in cands:                      # else an exact divisor, single step
        if b % c == 0:
            return c
    return b                             # b not a multiple of 8: one full block


def _pick_tn(L_pad, p, tb):
    """Class tile (multiple of 128 dividing L_pad): keep means (x2 buffers)
    plus the output tile (x2 buffers) under ~16 MiB so large class counts
    still fit v7x / v5e scoped VMEM."""
    budget = 16 * 1024 * 1024
    m = L_pad // 128
    per_lane_bytes = (2 * _round_up(p, 8) + 2 * tb) * 4
    for d in range(m, 0, -1):
        if m % d == 0 and per_lane_bytes * 128 * d <= budget:
            return 128 * d
    return 128


def _mm_lda_kernel(x_ref, mt_ref, mn2_ref, o_ref, *, C, normalize):
    # x_ref:  (tb, p)    VMEM  (batch tile, native dtype / native feature width)
    # mt_ref: (p, tn)    VMEM  (pre-transposed means tile, f32 or bf16)
    # mn2_ref:(1, tn)    VMEM  (precomputed ||m_l||^2, f32)
    # o_ref:  (tb, tn)   VMEM  (lane-dense logits tile, f32)
    x = x_ref[...]
    x32 = x.astype(jnp.float32)

    # MXU: cross term x @ m^T with f32 accumulation (bf16 feed if means are bf16).
    cross = jnp.dot(x.astype(mt_ref.dtype), mt_ref[...],
                    preferred_element_type=jnp.float32)            # (tb, tn)

    # ||x||^2 in f32 (zero-free: no feature padding exists).
    xnorm2 = jnp.sum(x32 * x32, axis=1, keepdims=True)             # (tb, 1)

    if normalize:
        # Fold L2-normalization-to-radius-C into the expanded form
        # (matches reference eps placement: x / (||x|| + 1e-10) * C).
        s = C * pl.reciprocal(jnp.sqrt(xnorm2) + 1e-10, approx=False)
        cross = cross * s
        xnorm2 = xnorm2 * (s * s)

    o_ref[...] = 2.0 * cross - xnorm2 - mn2_ref[...]


def mm_lda_forward(x, means_t, m_norm2, *, C, normalize, class_num):
    """x: (b, p) -> logits (b, class_num) float32.

    means_t:  (p, L_pad) transposed means (L zero-padded to multiple of 128).
    m_norm2:  (1, L_pad) float32 squared norms (0 in padding).
    """
    b, p = x.shape
    p_m, L_pad = means_t.shape
    assert p == p_m and class_num <= L_pad

    out_rows = b
    tb = _pick_tb(b, p, x.dtype.itemsize)
    if tb == b and b % 8 != 0 and b > 1024:
        # Pathological large batch not a multiple of 8: pad it (one extra copy)
        # rather than using one giant VMEM block.
        tb = 256
        b_padded = _round_up(b, tb)
        x = jnp.pad(x, ((0, b_padded - b), (0, 0)))
        b = b_padded
    n_b = b // tb

    tn = _pick_tn(L_pad, p, tb)
    n_l = L_pad // tn

    if n_l == 1:
        # means / ||m||^2 are grid-constant: single VMEM buffer is enough.
        mt_spec = pl.BlockSpec((p, tn), lambda lj, bi: (0, 0),
                               pipeline_mode=pl.Buffered(1))
        mn2_spec = pl.BlockSpec((1, tn), lambda lj, bi: (0, 0),
                                pipeline_mode=pl.Buffered(1))
        means_bufs = 1
    else:
        # L is tiled: means tiles stream (fetched once per outer L step).
        mt_spec = pl.BlockSpec((p, tn), lambda lj, bi: (0, lj))
        mn2_spec = pl.BlockSpec((1, tn), lambda lj, bi: (0, lj))
        means_bufs = 2

    # Explicit scoped-VMEM limit derived from the working set (with margin),
    # clamped to 64 MiB so it is valid on v5e / v6e / v7x alike.
    needed = (2 * tb * _round_up(p, 128) * x.dtype.itemsize
              + means_bufs * _round_up(p, 8) * tn * means_t.dtype.itemsize
              + means_bufs * 8 * tn * 4
              + 2 * tb * tn * 4)
    vmem_limit = int(min(64 * 1024 * 1024, max(2 * needed, 16 * 1024 * 1024)))

    kernel = functools.partial(_mm_lda_kernel, C=float(C), normalize=bool(normalize))

    out_pad = pl.pallas_call(
        kernel,
        out_shape=jax.ShapeDtypeStruct((b, L_pad), jnp.float32),
        grid_spec=pltpu.PrefetchScalarGridSpec(
            num_scalar_prefetch=0,
            grid=(n_l, n_b),                 # L outer, batch inner
            in_specs=[
                pl.BlockSpec((tb, p), lambda lj, bi: (bi, 0)),
                mt_spec,
                mn2_spec,
            ],
            out_specs=pl.BlockSpec((tb, tn), lambda lj, bi: (bi, lj)),
        ),
        compiler_params=pltpu.CompilerParams(
            dimension_semantics=("parallel", "parallel"),
            vmem_limit_bytes=vmem_limit,
        ),
    )(x, means_t, m_norm2)

    # The class slice is the only unavoidable copy (L is padded to 128 lanes
    # for a lane-dense store); consumers able to mask padded classes could
    # take out_pad directly and skip this.
    return out_pad[:out_rows, :class_num]


class MM_LDA_Pallas:
    """Thin wrapper mirroring the PyTorch module's __init__/forward."""

    def __init__(self, C, n_dense, class_num, Normalize=False, mxu_dtype=jnp.float32):
        self.C = float(C)
        self.class_num = class_num
        self.Normalize = Normalize
        self.n_dense = n_dense

        means = _generate_opt_means(C, n_dense, class_num)          # (L, p) float64

        L_pad = max(128, _round_up(class_num, 128))

        mt = np.zeros((n_dense, L_pad), dtype=np.float64)
        mt[:, :class_num] = means.T
        # Means in the MXU feed dtype (f32 default; bf16 optional on v6e/v7x).
        self.means_t = jnp.asarray(mt, dtype=mxu_dtype)             # (p, L_pad)

        mn2 = np.zeros((1, L_pad), dtype=np.float64)
        mn2[0, :class_num] = np.sum(means * means, axis=1)
        self.m_norm2 = jnp.asarray(mn2, dtype=jnp.float32)          # (1, L_pad)

    def __call__(self, x):
        return mm_lda_forward(
            x, self.means_t, self.m_norm2,
            C=self.C, normalize=self.Normalize, class_num=self.class_num,
        )


if __name__ == "__main__":
    def ref_logits(x_np, means_np, C, normalize):
        x64 = np.asarray(x_np, dtype=np.float64)
        if normalize:
            x64 = x64 / (np.linalg.norm(x64, axis=1, keepdims=True) + 1e-10) * C
        return -np.sum((x64[:, None, :] - means_np[None, :, :]) ** 2, axis=2)

    C = 1.0
    key = jax.random.PRNGKey(0)

    # --- Case 1: small aligned shapes, Normalize False/True ---
    batch, n_dense, class_num = 8, 32, 10
    x = jax.random.normal(key, (batch, n_dense), dtype=jnp.float32)
    means_np = _generate_opt_means(C, n_dense, class_num)

    for norm in (False, True):
        model = MM_LDA_Pallas(C=C, n_dense=n_dense, class_num=class_num, Normalize=norm)
        logits = jax.block_until_ready(model(x))
        ref = ref_logits(np.asarray(x), means_np, C, norm)
        np.testing.assert_allclose(np.asarray(logits, dtype=np.float64), ref,
                                   rtol=1e-4, atol=1e-4)

    # --- Case 2: multi-step batch grid + unaligned feature dim ---
    batch2, n_dense2, class_num2 = 48, 36, 10
    x2 = jax.random.normal(jax.random.PRNGKey(0), (batch2, n_dense2), dtype=jnp.float32)
    means2_np = _generate_opt_means(C, n_dense2, class_num2)
    model2 = MM_LDA_Pallas(C=C, n_dense=n_dense2, class_num=class_num2, Normalize=False)
    logits2 = jax.block_until_ready(model2(x2))
    ref2 = ref_logits(np.asarray(x2), means2_np, C, False)
    np.testing.assert_allclose(np.asarray(logits2, dtype=np.float64), ref2,
                               rtol=1e-4, atol=1e-4)

    # --- Case 3: optional bf16 MXU feed (v6e/v7x fast path), loose tolerance ---
    model_bf16 = MM_LDA_Pallas(C=C, n_dense=n_dense, class_num=class_num,
                               Normalize=False, mxu_dtype=jnp.bfloat16)
    logits_bf16 = jax.block_until_ready(model_bf16(x))
    ref_b = ref_logits(np.asarray(x), means_np, C, False)
    np.testing.assert_allclose(np.asarray(logits_bf16, dtype=np.float64), ref_b,
                               rtol=1e-1, atol=1e-1)

    print("KERNEL_OK")
</pallas_src>

<mosaic_0001>
module attributes {stable_mosaic.version = 11 : i64} {
  func.func @_mm_lda_kernel(%arg0: i32, %arg1: i32, %arg2: memref<8x32xf32, #tpu.memory_space<vmem>>, %arg3: memref<32x128xf32, #tpu.memory_space<vmem>>, %arg4: memref<1x128xf32, #tpu.memory_space<vmem>>, %arg5: memref<8x128xf32, #tpu.memory_space<vmem>>) attributes {dimension_semantics = [#tpu.dimension_semantics<parallel>, #tpu.dimension_semantics<parallel>], iteration_bounds = array<i64: 1, 1>, scalar_prefetch = 0 : i64, scratch_operands = 0 : i64, tpu.core_type = #tpu.core_type<tc>, window_params = [{transform_indices = @transform_0, window_bounds = array<i64: 8, 32>}, {pipeline_mode = #tpu.pipeline_mode<synchronous>, transform_indices = @transform_1, window_bounds = array<i64: 32, 128>}, {pipeline_mode = #tpu.pipeline_mode<synchronous>, transform_indices = @transform_2, window_bounds = array<i64: 1, 128>}, {transform_indices = @transform_3, window_bounds = array<i64: 8, 128>}]} {
    %c0 = arith.constant 0 : index
    %c0_0 = arith.constant 0 : index
    %0 = vector.load %arg2[%c0, %c0_0] : memref<8x32xf32, #tpu.memory_space<vmem>>, vector<8x32xf32>
    %c0_1 = arith.constant 0 : index
    %c0_2 = arith.constant 0 : index
    %1 = vector.load %arg3[%c0_1, %c0_2] : memref<32x128xf32, #tpu.memory_space<vmem>>, vector<32x128xf32>
    %cst = arith.constant dense<0.000000e+00> : vector<8x128xf32>
    %2 = tpu.matmul %0, %1, %cst {dimension_numbers = #tpu.dot_dimension_numbers<[1], [0], [0], [1], [0, 0, 1, 1], [], []>} : vector<8x32xf32>, vector<32x128xf32>, vector<8x128xf32> -> vector<8x128xf32>
    %3 = arith.mulf %0, %0 : vector<8x32xf32>
    %cst_3 = arith.constant dense<0.000000e+00> : vector<8xf32>
    %4 = vector.multi_reduction <add>, %3, %cst_3 [1] : vector<8x32xf32> to vector<8xf32>
    %5 = vector.shape_cast %4 : vector<8xf32> to vector<8x1xf32>
    %cst_4 = arith.constant 2.000000e+00 : f32
    %6 = vector.broadcast %cst_4 : f32 to vector<8x128xf32>
    %7 = arith.mulf %6, %2 : vector<8x128xf32>
    %8 = vector.broadcast %5 : vector<8x1xf32> to vector<8x128xf32>
    %9 = arith.subf %7, %8 : vector<8x128xf32>
    %c0_5 = arith.constant 0 : index
    %c0_6 = arith.constant 0 : index
    %10 = vector.load %arg4[%c0_5, %c0_6] : memref<1x128xf32, #tpu.memory_space<vmem>>, vector<1x128xf32>
    %11 = vector.broadcast %10 : vector<1x128xf32> to vector<8x128xf32>
    %12 = arith.subf %9, %11 : vector<8x128xf32>
    %c0_7 = arith.constant 0 : index
    %c0_8 = arith.constant 0 : index
    %13 = vector.load %arg5[%c0_7, %c0_8] : memref<8x128xf32, #tpu.memory_space<vmem>>, vector<8x128xf32>
    tpu.vector_store %arg5[%c0_7, %c0_8], %12 {strides = array<i32>} : memref<8x128xf32, #tpu.memory_space<vmem>>, vector<8x128xf32>,
    return
  }
  func.func @transform_0(%arg0: i32, %arg1: i32) -> (i32, i32) {
    %c0_i32 = arith.constant 0 : i32
    %c0_i32_0 = arith.constant 0 : i32
    return %arg1, %c0_i32 : i32, i32
  }
  func.func @transform_1(%arg0: i32, %arg1: i32) -> (i32, i32) {
    %c0_i32 = arith.constant 0 : i32
    %c0_i32_0 = arith.constant 0 : i32
    %c0_i32_1 = arith.constant 0 : i32
    return %c0_i32, %c0_i32_0 : i32, i32
  }
  func.func @transform_2(%arg0: i32, %arg1: i32) -> (i32, i32) {
    %c0_i32 = arith.constant 0 : i32
    %c0_i32_0 = arith.constant 0 : i32
    %c0_i32_1 = arith.constant 0 : i32
    return %c0_i32, %c0_i32_0 : i32, i32
  }
  func.func @transform_3(%arg0: i32, %arg1: i32) -> (i32, i32) {
    %c0_i32 = arith.constant 0 : i32
    return %arg1, %arg0 : i32, i32
  }
}

</mosaic_0001>

<bundles_post_ra>
// kernel: tpu_custom_call.1
= control target key start
LH: loop header
LB: loop body
LE: loop exit
PB: predicated region body
PF: predicated region fallthrough
CT: control target
= control target key end

     0   :  { %8 = vsyncpa [#allocation3], 0  ;;  %s329_s0 = inlined_call_operand.hbm [shape: f32[8,32], index: 0, kind: input, shape index: {}]   ;;  %s330_s1 = inlined_call_operand.hbm [shape: f32[32,128], index: 1, kind: input, shape index: {}]   ;;  %s331_s2 = inlined_call_operand.vmem [shape: f32[1,128], index: 2, kind: input, shape index: {}]   ;;  %s332_s3 = inlined_call_operand.hbm [shape: f32[8,128], index: 3, kind: output, shape index: {}]  }
   0x1   :  { %9 = vsyncpa [#allocation6], 0 }
   0x2   :  { %10 = vsyncpa [#allocation4], 0  ;;  %s255_s12 = smov [#allocation2]   ;;  %s256_s14 = smov [#allocation5]  }
   0x3   :  { %s17_s13 = sshll.u32 %s255_s12, 4  ;;  %s26_s15 = sshll.u32 %s256_s14, 4  ;;  %s18_s13 = int_to_ptr.vmem [resolvable:$true] %s17_s13  ;;  %s283_s15 = int_to_ptr.vmem [resolvable:$true] %s26_s15 }
   0x4   :  { %s183_s18 = scalar_lea.hbm %s329_s0, 128 }
   0x5   :  { %p184_p0 = scmp.ne.s32.totalorder %s329_s0, %s183_s18  ;;  %p187_p1 = scmp.lt.u32.totalorder %s183_s18, %s329_s0 }
   0x7   :  { %p189_p2 = pnand %p187_p1, %p184_p0 }
   0x9   :  { %192 = shalt.err (!%p189_p2)
}
   0xa   :  { %s193_s23 = scalar_lea.vmem %s18_s13, 128  ;;  %p198_p4 = scmp.lt.s32.totalorder %s18_s13, %s18_s13 }
   0xb   :  { %p194_p3 = scmp.ne.s32.totalorder %s18_s13, %s193_s23  ;;  %p199_p5 = scmp.lt.s32.totalorder %s193_s23, %s193_s23 }
   0xd   :  { %p200_p6 = por %p199_p5, %p198_p4 }
   0xf   :  { %p201_p7 = pnand %p200_p6, %p194_p3 }
  0x11   :  { %204 = shalt.err (!%p201_p7)
}
  0x12   :  { %20 = dma.hbm_to_vmem [thread:$0]  %s329_s0, 128, %s18_s13, [#allocation3]  }
  0x13   :  { %s205_s28 = scalar_lea.hbm %s330_s1, 512 }
  0x14   :  { %p206_p8 = scmp.ne.s32.totalorder %s330_s1, %s205_s28  ;;  %p209_p9 = scmp.lt.u32.totalorder %s205_s28, %s330_s1 }
  0x16   :  { %p211_p10 = pnand %p209_p9, %p206_p8 }
  0x18   :  { %214 = shalt.err (!%p211_p10)
}
  0x19   :  { %s215_s6 = scalar_lea.vmem %s283_s15, 512  ;;  %p220_p12 = scmp.lt.s32.totalorder %s283_s15, %s283_s15 }
  0x1a   :  { %p216_p11 = scmp.ne.s32.totalorder %s283_s15, %s215_s6  ;;  %p221_p13 = scmp.lt.s32.totalorder %s215_s6, %s215_s6 }
  0x1c   :  { %p222_p0 = por %p221_p13, %p220_p12 }
  0x1e   :  { %p223_p1 = pnand %p222_p0, %p216_p11 }
  0x20   :  { %226 = shalt.err (!%p223_p1)
}
  0x21   :  { %s257_s0 = smov 128   ;;  %s258_s7 = smov 8  }
  0x22   :  { %32 = dma.hbm_to_vmem [thread:$0]  %s330_s1, 512, %s283_s15, [#allocation6], %s257_s0, %s257_s0, %s258_s7  }
  0x23   :  { %249 = dma.done.wait [#allocation3], 128  }
  0x24   :  { %250 = vsyncadd [#allocation3], 4294967168 }
  0x25   :  { %251 = dma.done.wait [#allocation6], 512  }
  0x26   :  { %252 = vsyncadd [#allocation6], 4294966784  ;;  %v259_v0 = vmov 0.0|0.0   ;;  %vm260_vm0 = vmmov 0   ;;  %v261_v1 = vmov 0.0   ;;  %v42_v2 = vld [vmem:[#allocation5] sm:$0xff] }
  0x27   :  { %169 = vmatprep.subr.bf16.mxu0 %v259_v0  ;;  %166 = vmatprep.mubr.msk.f32.mxu0 %vm260_vm0, %v261_v1  ;;  %v43_v3 = vld [vmem:[#allocation5 + $0x8] sm:$0xff]  ;;  %v44_v4 = vld [vmem:[#allocation5 + $0x10] sm:$0xff]  ;;  %v45_v6 = vld [vmem:[#allocation5 + $0x18] sm:$0xff]  ;;  %vm46_vm1 = vcmask 261120   ;;  %s262_s11 = smov [#allocation7]  }
  0x28   :  { %v170_v5 = vpack.c.bf16 %v43_v3, %v42_v2  ;;  %v41_v7 = vld [vmem:[#allocation2] sm:$0xff]  ;;  %v173_v9 = vpack.c.bf16 %v45_v6, %v44_v4  ;;  %s141_s12 = sshll.u32 %s262_s11, 4  ;;  %s142_s12 = int_to_ptr.vmem [resolvable:$true] %s141_s12 }
  0x29   :  { %v120_v8 = vmul.f32 %v41_v7, %v41_v7  ;;  %v152_v15 = vld [vmem:[%s331_s2] ss:$0 sm:$0xff]  ;;  %s227_s13 = scalar_lea.vmem %s142_s12, 128  ;;  %p232_p3 = scmp.lt.s32.totalorder %s142_s12, %s142_s12 }
  0x2a   :  { %171 = vmatpush3.bf16.msra.mxu0 %v170_v5  ;;  %p228_p2 = scmp.ne.s32.totalorder %s142_s12, %s227_s13  ;;  %p233_p4 = scmp.lt.s32.totalorder %s227_s13, %s227_s13 }
  0x2b   :  { %172 = vmatprep.subr.bf16.mxu0 %v259_v0  ;;  %v121_v10 = vsel %vm46_vm1, %v120_v8, 0.0 }
  0x2c   :  { %122 = vadd.xlane.f32.xlu0 %v121_v10  ;;  %p234_p5 = por %p233_p4, %p232_p3 }
  0x2e   :  { %174 = vmatpush3.bf16.msra.mxu0 %v173_v9  ;;  %p235_p6 = pnand %p234_p5, %p228_p2 }
  0x31   :  { %167 = vmatmul.mubr.msk.f32.vlgmr.msra.gmra.mrb[0].mxu0 %vm46_vm1, %v41_v7 }
  0xb9   :  { %v123_v12 = vpop.xlane.xlu0 %122 }
 0x104   :  { %v116_v11 = vpop.f32.mrb[0].mxu0 }
 0x105   :  { %v124_v13 = vmul.f32 2.0, %v116_v11  ;;  %v168_v14 = vpop.f32.mrb[1].mxu0 }
 0x107   :  { %v125_v16 = vsub.f32 %v124_v13, %v123_v12 }
 0x109   :  { %v133_v17 = vsub.f32 %v125_v16, %v152_v15 }
 0x10b   :  { %134 = vst [vmem:[#allocation7] sm:$0xff] %v133_v17 }
 0x10c   :  { %238 = shalt.err (!%p235_p6)
}
 0x10d   :  { %s239_s16 = scalar_lea.hbm %s332_s3, 128 }
 0x10e   :  { %p240_p7 = scmp.ne.s32.totalorder %s332_s3, %s239_s16  ;;  %p243_p8 = scmp.lt.u32.totalorder %s239_s16, %s332_s3 }
 0x110   :  { %p245_p9 = pnand %p243_p8, %p240_p7 }
 0x112   :  { %248 = shalt.err (!%p245_p9)
}
 0x113   :  { %144 = dma.vmem_to_hbm [thread:$0]  %s142_s12, 128, %s332_s3, [#allocation4]  }
 0x114   :  { %253 = dma.done.wait [#allocation4], 128  }
 0x115   :  { %254 = vsyncadd [#allocation4], 4294967168 }
 0x116   :  { %148 = vsyncpa [#allocation3], 1 }
 0x117   :  { %149 = vsyncpa [#allocation6], 1 }
 0x118   :  { %150 = vsyncpa [#allocation4], 1 }

</bundles_post_ra>
